<compile_context>
chip_gen: v7x
topology: tpu7x:2x2x1
jax: 0.10.0
libtpu: 0.0.40
codegen_flags: <defaults>
</compile_context>

<pallas_src>
import functools

import jax
import jax.numpy as jnp
from jax import lax
from jax.experimental import pallas as pl
from jax.experimental.pallas import tpu as pltpu


def _single_conv_kernel(x_ref, w_ref, b_ref, out_ref, *, blk_h, out_w, pad_w, cout):
    # Block shapes (one grid step = one row block of one batch element):
    #   x_ref   : ((H+2)*pad_w, Cin)  bf16  whole zero-padded image with rows flattened
    #                                       (resident in VMEM across the row-block axis;
    #                                        pad_w = W+2 rounded up to a multiple of 8)
    #   w_ref   : (Cin, 9*Cout)       bf16  BN-scale-folded taps, column = (ky*3+kx)*Cout + co
    #   b_ref   : (1, Cout)           f32   folded BN shift (conv bias when bn=False)
    #   out_ref : (blk_h, W*Cout)     f32   one output row block, W and Cout merged on lanes
    r = pl.program_id(1)
    row_start = pl.multiple_of(r * (blk_h * pad_w), blk_h * pad_w)

    # Padded rows [r*blk_h, r*blk_h + blk_h + 2) -> one contiguous slice in the flattened layout.
    x_flat = x_ref[pl.ds(row_start, (blk_h + 2) * pad_w), :]          # ((blk_h+2)*pad_w, Cin) bf16

    # All 9 taps in a single MXU matmul, f32 accumulation.
    y_all = jnp.dot(x_flat, w_ref[...], preferred_element_type=jnp.float32)
    y3 = y_all.reshape(blk_h + 2, pad_w, 9 * cout)                    # aligned sublane split

    # Combine the taps with static shifted adds (VPU/XLU); the zero padding already provides the
    # border zeros, so no masking is required.
    acc = None
    for ky in range(3):
        for kx in range(3):
            t = ky * 3 + kx
            tap = y3[ky:ky + blk_h, kx:kx + out_w, t * cout:(t + 1) * cout]   # (blk_h, W, Cout)
            acc = tap if acc is None else acc + tap

    y = jnp.maximum(acc + b_ref[...], 0.0)                            # BN shift / bias + ReLU (f32)
    out_ref[...] = y.reshape(blk_h, out_w * cout)                     # lane-dense store


def single_conv_forward(x_nchw, params, *, row_block=8):
    """SingleConv forward. params = (w_hwio f32 (3,3,Cin,Cout), scale (Cout,), shift (Cout,))."""
    w_hwio, scale, shift = params
    n, cin, h, w = x_nchw.shape
    cout = w_hwio.shape[3]

    th = row_block if (h % row_block == 0) else h                     # output rows per grid step
    wp = ((w + 2 + 7) // 8) * 8                                       # padded width, 8-aligned
    hp = h + 2

    # NCHW -> NHWC, bf16, zero-pad (1px conv halo + width alignment), flatten the padded rows.
    x = jnp.transpose(x_nchw, (0, 2, 3, 1)).astype(jnp.bfloat16)
    x_pad = jnp.pad(x, ((0, 0), (1, 1), (1, wp - w - 1), (0, 0)))
    x_flat = x_pad.reshape(n, hp * wp, cin)

    # Fold the BN scale into the conv weights (exact, done in f32); pack the 9 taps into a single
    # (Cin, 9*Cout) matrix with column index = (ky*3 + kx)*Cout + co.
    w_scaled = w_hwio * scale.reshape(1, 1, 1, cout)
    w_all = jnp.transpose(w_scaled.reshape(9, cin, cout), (1, 0, 2)).reshape(cin, 9 * cout)
    w_all = w_all.astype(jnp.bfloat16)
    b_row = shift.reshape(1, cout).astype(jnp.float32)

    kernel = functools.partial(_single_conv_kernel, blk_h=th, out_w=w, pad_w=wp, cout=cout)

    out = pl.pallas_call(
        kernel,
        out_shape=jax.ShapeDtypeStruct((n, h, w * cout), jnp.float32),
        grid_spec=pltpu.PrefetchScalarGridSpec(
            num_scalar_prefetch=0,
            grid=(n, h // th),
            in_specs=[
                # Whole padded image; its block index is constant along the row-block axis, so it
                # is DMA'd into VMEM once per image and stays resident while the strips stream out.
                pl.BlockSpec((None, hp * wp, cin), lambda b, r: (b, 0, 0)),
                pl.BlockSpec((cin, 9 * cout), lambda b, r: (0, 0)),
                pl.BlockSpec((1, cout), lambda b, r: (0, 0)),
            ],
            out_specs=pl.BlockSpec((None, th, w * cout), lambda b, r: (b, r, 0)),
        ),
        compiler_params=pltpu.CompilerParams(
            dimension_semantics=("parallel", "arbitrary"),            # batch fully independent
            vmem_limit_bytes=32 * 1024 * 1024,
        ),
    )(x_flat, w_all, b_row)

    # (N, H, W*Cout) -> (N, Cout, H, W)
    return jnp.transpose(out.reshape(n, h, w, cout), (0, 3, 1, 2))


def make_params(key, cin, cout, bn=True, eps=1e-5):
    """Build PyTorch-equivalent parameters; BN (eval mode) folded to per-channel scale/shift."""
    ks = jax.random.split(key, 6)
    w_oihw = 0.1 * jax.random.normal(ks[0], (cout, cin, 3, 3), jnp.float32)   # PyTorch OIHW
    w_hwio = jnp.transpose(w_oihw, (2, 3, 1, 0))                              # -> HWIO
    if bn:
        gamma = 1.0 + 0.05 * jax.random.normal(ks[1], (cout,), jnp.float32)
        beta = 0.05 * jax.random.normal(ks[2], (cout,), jnp.float32)
        rmean = 0.05 * jax.random.normal(ks[3], (cout,), jnp.float32)
        rvar = 0.5 + jnp.abs(0.2 * jax.random.normal(ks[4], (cout,), jnp.float32))
        scale = gamma / jnp.sqrt(rvar + eps)
        shift = beta - rmean * scale
    else:
        # Conv2d(bias=True) path: scale = 1, shift = conv bias.
        scale = jnp.ones((cout,), jnp.float32)
        shift = 0.05 * jax.random.normal(ks[5], (cout,), jnp.float32)
    return (w_hwio, scale, shift)


def reference_forward(x_nchw, params):
    # Pure-JAX (XLA) reference for correctness checking, full f32 precision.
    w_hwio, scale, shift = params
    x = jnp.transpose(x_nchw, (0, 2, 3, 1)).astype(jnp.float32)
    dn = ('NHWC', 'HWIO', 'NHWC')
    y = lax.conv_general_dilated(x, w_hwio, (1, 1), 'SAME', dimension_numbers=dn,
                                 precision=lax.Precision.HIGHEST)
    y = jnp.maximum(y * scale + shift, 0.0)
    return jnp.transpose(y, (0, 3, 1, 2))


if __name__ == "__main__":
    N, Cin, Cout, H, W = 2, 4, 8, 16, 16
    key = jax.random.PRNGKey(0)
    kx, kp = jax.random.split(key)
    x = jax.random.normal(kx, (N, Cin, H, W), jnp.float32)
    params = make_params(kp, Cin, Cout, bn=True)

    out = jax.block_until_ready(single_conv_forward(x, params))
    assert out.shape == (N, Cout, H, W)

    ref = reference_forward(x, params)
    max_err = float(jnp.max(jnp.abs(out - ref)))
    # bf16 inputs/weights on the MXU (f32 accumulation) -> loosened tolerance vs the f32 reference.
    if max_err > 5e-2:
        raise AssertionError(f"Pallas kernel mismatch vs reference, max abs err = {max_err}")
    print("KERNEL_OK")
</pallas_src>

<mosaic_0001>
module attributes {stable_mosaic.version = 11 : i64} {
  func.func @_single_conv_kernel(%arg0: i32, %arg1: i32, %arg2: memref<1x432x4xbf16, #tpu.memory_space<vmem>>, %arg3: memref<4x72xbf16, #tpu.memory_space<vmem>>, %arg4: memref<1x8xf32, #tpu.memory_space<vmem>>, %arg5: memref<1x8x128xf32, #tpu.memory_space<vmem>>) attributes {dimension_semantics = [#tpu.dimension_semantics<parallel>, #tpu.dimension_semantics<arbitrary>], iteration_bounds = array<i64: 2, 2>, scalar_prefetch = 0 : i64, scratch_operands = 0 : i64, tpu.core_type = #tpu.core_type<tc>, window_params = [{transform_indices = @transform_0, window_bounds = array<i64: 1, 432, 4>}, {pipeline_mode = #tpu.pipeline_mode<synchronous>, transform_indices = @transform_1, window_bounds = array<i64: 4, 72>}, {pipeline_mode = #tpu.pipeline_mode<synchronous>, transform_indices = @transform_2, window_bounds = array<i64: 1, 8>}, {transform_indices = @transform_3, window_bounds = array<i64: 1, 8, 128>}]} {
    %c192_i32 = arith.constant 192 : i32
    %0 = arith.muli %arg1, %c192_i32 : i32
    %1 = tpu.assume_multiple %0, 192 : i32
    %c0 = arith.constant 0 : index
    %2 = arith.index_cast %1 : i32 to index
    %c0_0 = arith.constant 0 : index
    %3 = vector.load %arg2[%c0, %2, %c0_0] : memref<1x432x4xbf16, #tpu.memory_space<vmem>>, vector<1x240x4xbf16>
    %4 = vector.shape_cast %3 : vector<1x240x4xbf16> to vector<240x4xbf16>
    %c0_1 = arith.constant 0 : index
    %c0_2 = arith.constant 0 : index
    %5 = vector.load %arg3[%c0_1, %c0_2] : memref<4x72xbf16, #tpu.memory_space<vmem>>, vector<4x72xbf16>
    %cst = arith.constant dense<0.000000e+00> : vector<240x72xf32>
    %6 = tpu.matmul %4, %5, %cst {dimension_numbers = #tpu.dot_dimension_numbers<[1], [0], [0], [1], [0, 0, 1, 1], [], []>} : vector<240x4xbf16>, vector<4x72xbf16>, vector<240x72xf32> -> vector<240x72xf32>
    %7 = vector.shape_cast %6 : vector<240x72xf32> to vector<10x24x72xf32>
    %8 = vector.extract_strided_slice %7 {offsets = [0, 0, 0], sizes = [8, 16, 8], strides = [1, 1, 1]} : vector<10x24x72xf32> to vector<8x16x8xf32>
    %9 = vector.extract_strided_slice %7 {offsets = [0, 1, 8], sizes = [8, 16, 8], strides = [1, 1, 1]} : vector<10x24x72xf32> to vector<8x16x8xf32>
    %10 = arith.addf %8, %9 : vector<8x16x8xf32>
    %11 = vector.extract_strided_slice %7 {offsets = [0, 2, 16], sizes = [8, 16, 8], strides = [1, 1, 1]} : vector<10x24x72xf32> to vector<8x16x8xf32>
    %12 = arith.addf %10, %11 : vector<8x16x8xf32>
    %13 = vector.extract_strided_slice %7 {offsets = [1, 0, 24], sizes = [8, 16, 8], strides = [1, 1, 1]} : vector<10x24x72xf32> to vector<8x16x8xf32>
    %14 = arith.addf %12, %13 : vector<8x16x8xf32>
    %15 = vector.extract_strided_slice %7 {offsets = [1, 1, 32], sizes = [8, 16, 8], strides = [1, 1, 1]} : vector<10x24x72xf32> to vector<8x16x8xf32>
    %16 = arith.addf %14, %15 : vector<8x16x8xf32>
    %17 = vector.extract_strided_slice %7 {offsets = [1, 2, 40], sizes = [8, 16, 8], strides = [1, 1, 1]} : vector<10x24x72xf32> to vector<8x16x8xf32>
    %18 = arith.addf %16, %17 : vector<8x16x8xf32>
    %19 = vector.extract_strided_slice %7 {offsets = [2, 0, 48], sizes = [8, 16, 8], strides = [1, 1, 1]} : vector<10x24x72xf32> to vector<8x16x8xf32>
    %20 = arith.addf %18, %19 : vector<8x16x8xf32>
    %21 = vector.extract_strided_slice %7 {offsets = [2, 1, 56], sizes = [8, 16, 8], strides = [1, 1, 1]} : vector<10x24x72xf32> to vector<8x16x8xf32>
    %22 = arith.addf %20, %21 : vector<8x16x8xf32>
    %23 = vector.extract_strided_slice %7 {offsets = [2, 2, 64], sizes = [8, 16, 8], strides = [1, 1, 1]} : vector<10x24x72xf32> to vector<8x16x8xf32>
    %24 = arith.addf %22, %23 : vector<8x16x8xf32>
    %c0_3 = arith.constant 0 : index
    %c0_4 = arith.constant 0 : index
    %25 = vector.load %arg4[%c0_3, %c0_4] : memref<1x8xf32, #tpu.memory_space<vmem>>, vector<1x8xf32>
    %26 = vector.shape_cast %25 : vector<1x8xf32> to vector<1x1x8xf32>
    %27 = vector.broadcast %26 : vector<1x1x8xf32> to vector<8x16x8xf32>
    %28 = arith.addf %24, %27 : vector<8x16x8xf32>
    %cst_5 = arith.constant 0.000000e+00 : f32
    %29 = vector.broadcast %cst_5 : f32 to vector<8x16x8xf32>
    %30 = arith.maximumf %28, %29 : vector<8x16x8xf32>
    %31 = vector.shape_cast %30 : vector<8x16x8xf32> to vector<8x128xf32>
    %c0_6 = arith.constant 0 : index
    %c0_7 = arith.constant 0 : index
    %c0_8 = arith.constant 0 : index
    %32 = vector.load %arg5[%c0_6, %c0_7, %c0_8] : memref<1x8x128xf32, #tpu.memory_space<vmem>>, vector<1x8x128xf32>
    %33 = vector.shape_cast %32 : vector<1x8x128xf32> to vector<8x128xf32>
    %34 = vector.shape_cast %31 : vector<8x128xf32> to vector<1x8x128xf32>
    tpu.vector_store %arg5[%c0_6, %c0_7, %c0_8], %34 {strides = array<i32>} : memref<1x8x128xf32, #tpu.memory_space<vmem>>, vector<1x8x128xf32>,
    return
  }
  func.func @transform_0(%arg0: i32, %arg1: i32) -> (i32, i32, i32) {
    %c0_i32 = arith.constant 0 : i32
    %c0_i32_0 = arith.constant 0 : i32
    %c0_i32_1 = arith.constant 0 : i32
    return %arg0, %c0_i32, %c0_i32_0 : i32, i32, i32
  }
  func.func @transform_1(%arg0: i32, %arg1: i32) -> (i32, i32) {
    %c0_i32 = arith.constant 0 : i32
    %c0_i32_0 = arith.constant 0 : i32
    %c0_i32_1 = arith.constant 0 : i32
    return %c0_i32, %c0_i32_0 : i32, i32
  }
  func.func @transform_2(%arg0: i32, %arg1: i32) -> (i32, i32) {
    %c0_i32 = arith.constant 0 : i32
    %c0_i32_0 = arith.constant 0 : i32
    %c0_i32_1 = arith.constant 0 : i32
    return %c0_i32, %c0_i32_0 : i32, i32
  }
  func.func @transform_3(%arg0: i32, %arg1: i32) -> (i32, i32, i32) {
    %c0_i32 = arith.constant 0 : i32
    %c0_i32_0 = arith.constant 0 : i32
    return %arg0, %arg1, %c0_i32 : i32, i32, i32
  }
}

</mosaic_0001>

<bundles_post_ra>
// kernel: tpu_custom_call.1
= control target key start
LH: loop header
LB: loop body
LE: loop exit
PB: predicated region body
PF: predicated region fallthrough
CT: control target
= control target key end

     0   :  { %8 = vsyncpa [#allocation3], 0  ;;  %s2921_s0 = inlined_call_operand.vmem [shape: bf16[2,432,4], index: 0, kind: input, shape index: {}]   ;;  %s2922_s1 = inlined_call_operand.vmem [shape: bf16[4,72], index: 1, kind: input, shape index: {}]   ;;  %s2923_s2 = inlined_call_operand.vmem [shape: f32[1,8], index: 2, kind: input, shape index: {}]   ;;  %s2924_s3 = inlined_call_operand.hbm [shape: f32[2,16,128], index: 3, kind: output, shape index: {}]  }
   0x1   :  { %10 = vsyncpa [#allocation3 + $0x1], 0  ;;  %s2000_s12 = smov 0   ;;  %s2002_s13 = smov 0  }
   0x2   :  { %s2004_s14 = smov 0   ;;  %s2006_s15 = smov 0  }
   0x3   :  { %s2008_s16 = smov 0   ;;  %s2010_s17 = smov 0  }
   0x4   :  { %s2012_s18 = smov 0   ;;  %s2014_s19 = smov 0  }
   0x5 LB: > { %s1634_s20 = sadd.s32 4294967295, %s1958_s19   ;;  %s1635_s21 = sadd.s32 4294967294, %s1958_s19   ;;  %s1958_s19 = sphi %s2014_s19, %s16_s19   ;;  %s1954_s18 = sphi %s2012_s18, %s2968_s18   ;;  %s1950_s17 = sphi %s2010_s17, %s2967_s17   ;;  %s1946_s16 = sphi %s2008_s16, %s2966_s16   ;;  %s1942_s15 = sphi %s2006_s15, %s2965_s15   ;;  %s1938_s14 = sphi %s2004_s14, %s2964_s14   ;;  %s1934_s13 = sphi %s2002_s13, %s2963_s13   ;;  %s1930_s12 = sphi %s2000_s12, %s2962_s12  }
   0x6   : > { %s25_s22 = sadd.s32 1, %s1950_s17  ;;  %s28_s23 = sadd.s32 1, %s1954_s18 }
   0x7   : > { %p26_p0 = scmp.ge.s32.totalorder %s25_s22, 2  ;;  %p115_p1 = scmp.ne.s32.totalorder %s1938_s14, %s1934_s13 }
   0x8   : > { %p116_p2 = scmp.eq.s32.totalorder %s1634_s20, 3  ;;  %p121_p5 = scmp.ne.s32.totalorder %s1934_s13, %s1930_s12 }
   0x9   : > { %s2970_s22 = smov (%p26_p0, %s25_s22), 0  ;;  %s2972_s23 = smov (!%p26_p0, %s28_s23), %s1954_s18 }
   0xa   : > { %s101_s24 = ssub.s32 %s1950_s17, %s2970_s22  ;;  %p2051_p3 = por %p116_p2, %p115_p1 }
   0xb   : > { %p30_p4 = scmp.ge.s32.totalorder %s2972_s23, 2  ;;  %p122_p6 = scmp.eq.s32.totalorder %s1635_s21, 3 }
   0xc   : > { %p1638_p7 = scmp.ge.s32.totalorder %s1958_s19, 1  ;;  %p154_p9 = scmp.lt.s32.totalorder %s1958_s19, 5 }
   0xd   : > { %s2974_s23 = smov (%p30_p4, %s2972_s23), 0  ;;  %p2060_p8 = por %p122_p6, %p121_p5 }
   0xe   : > { %s100_s27 = ssub.s32 %s1954_s18, %s2974_s23  ;;  %s105_s28 = sadd.s32 1, %s1938_s14 }
   0xf   : > { %s102_s29 = sor.u32 %s101_s24, %s100_s27  ;;  %p155_p10 = pnand %p1638_p7, %p154_p9 }
  0x10   : > { %p103_p11 = scmp.eq.s32.totalorder %s102_s29, 0 }
  0x11   : > { %158 = sbr.rel (%p155_p10) target bundleno = 792 (0x318), region = 32 }
  0x12   : > { %s2069_s30 = scalar_select %p103_p11, %s1938_s14, %s105_s28  }
  0x18   : > { %v219_v0 = vld [vmem:[%s2922_s1] sm:$0x3]  ;;  %vm341_vm0 = vcmask 1041408   ;;  %p178_p12 = scmp.lt.s32.totalorder %s1946_s16, 1  ;;  %v1960_v1 = vmov 0.0   ;;  %s184_s6 = smul.u32 192, %s1942_s15 }
  0x19   : > { %1694 = vmatprep.subr.bf16.mxu0 %v1960_v1  ;;  %1756 = vmatprep.subr.bf16.mxu1 %v1960_v1  ;;  %v343_v2 = vsel %vm341_vm0, %v219_v0, 0  ;;  %vm1961_vm1 = vmmov 0   ;;  %vm295_vm2 = vcmask 31744   ;;  %vm522_vm3 = vcmask 1046528   ;;  %s1962_s27 = smov 104   ;;  %s1963_s28 = smov 80  }
  0x1a   : > { %1695 = vmatpush3.bf16.msra.mxu0 %v343_v2  ;;  %1757 = vmatpush3.bf16.msra.mxu1 %v343_v2  ;;  %s179_s7 = scalar_select %p178_p12, %s1946_s16, 1  ;;  %vm627_vm4 = vcmask 1045504   ;;  %vm1513_vm5 = vcmask 64512   ;;  %vm1515_vm6 = vcmask 130048   ;;  %vm1517_vm7 = vcmask 195584  }
  0x1b   : > { %1696 = vmatprep.mubr.msk.bf16.mxu0 %vm1961_vm1, %v1960_v1  ;;  %1728 = vmatprep.mubr.msk.bf16.mxu1 %vm1961_vm1, %v1960_v1  ;;  %s185_s8 = sshra.s32 %s184_s6, 3  ;;  %s2927_s29 = smov 120   ;;  %vm1519_vm8 = vcmask 261120   ;;  %vm1521_vm9 = vcmask 326656   ;;  %vm1523_vm10 = vcmask 392192   ;;  %vm1525_vm11 = vcmask 457728  }
  0x1c   : > { %s1758_s9 = smul.u32 216, %s179_s7  ;;  %s1641_s10 = sshll.u32 %s185_s8, 2  ;;  %vm1527_vm12 = vcmask 523264   ;;  %vm1529_vm13 = vcmask 588800   ;;  %vm1531_vm14 = vcmask 654336   ;;  %vm1533_vm15 = vcmask 719872  }
  0x1d   : > { %s1965_s4 = smov 112   ;;  %s1966_s5 = smov 88   ;;  %vm1535_vm0 = vcmask 785408  }
  0x1e   : > { %s182_s21 = scalar_lea.vmem %s2921_s0, %s1758_s9  ;;  %s1967_s6 = smov 96  }
  0x1f   : > { %s2082_s24 = scalar_lea.vmem %s182_s21, %s1641_s10  ;;  %s1968_s7 = smov 72  }
  0x20   : > { %v1849_v3 = vld [vmem:[%s2082_s24] sm:$0xff]   ;;  %v1851_v5 = vld [vmem:[%s2082_s24 + $0x8] sm:$0xff]   ;;  %v1853_v7 = vld [vmem:[%s2082_s24 + $0x10] sm:$0xff]   ;;  %s1969_s8 = smov 64   ;;  %s1972_s11 = smov 8  }
  0x21   : > { %v1850_v4 = vld [vmem:[%s2082_s24 + $0x40] sm:$0xff]   ;;  %1697 = vmatmul.mubr.msk.bf16.vlgmr.msra.gmra.mrb[0].mxu0 %vm295_vm2, %v1849_v3  ;;  %v1852_v6 = vld [vmem:[%s2082_s24 + $0x48] sm:$0xff]   ;;  %v1854_v8 = vld [vmem:[%s2082_s24 + $0x50] sm:$0xff]   ;;  %s1973_s20 = smov 16   ;;  %s1974_s21 = smov 24  }
  0x22   : > { %1729 = vmatmul.mubr.msk.bf16.vlgmr.msra.gmra.mrb[0].mxu1 %vm295_vm2, %v1850_v4  ;;  %1700 = vmatprep.mubr.msk.bf16.mxu0 %vm1961_vm1, %v1960_v1  ;;  %v1855_v9 = vld [vmem:[%s2082_s24 + $0x18] sm:$0xff]   ;;  %v1856_v11 = vld [vmem:[%s2082_s24 + $0x20] sm:$0xff]   ;;  %v1857_v13 = vld [vmem:[%s2082_s24 + $0x28] sm:$0xff]   ;;  %s1976_s9 = smov 40   ;;  %s1977_s10 = smov 48  }
  0x23   : > { %1732 = vmatprep.mubr.msk.bf16.mxu1 %vm1961_vm1, %v1960_v1  ;;  %v1858_v10 = vld [vmem:[%s2082_s24 + $0x58] sm:$0xff]   ;;  %v1861_v12 = vld [vmem:[%s2082_s24 + $0x60] sm:$0xff]   ;;  %v1862_v14 = vld [vmem:[%s2082_s24 + $0x68] sm:$0xff]  }
  0x24   : > { %v1859_v15 = vld [vmem:[%s2082_s24 + $0x30] sm:$0xff]   ;;  %v1860_v17 = vld [vmem:[%s2082_s24 + $0x38] sm:$0xff]  }
  0x25   : > { %v1863_v16 = vld [vmem:[%s2082_s24 + $0x70] sm:$0xff]   ;;  %s1975_s24 = smov 32  }
  0x29   : > { %1701 = vmatmul.mubr.msk.bf16.gmra.mrb[4].mxu0 %vm295_vm2, %v1851_v5 }
  0x2a   : > { %1733 = vmatmul.mubr.msk.bf16.gmra.mrb[4].mxu1 %vm295_vm2, %v1852_v6  ;;  %1704 = vmatprep.mubr.msk.bf16.mxu0 %vm1961_vm1, %v1960_v1 }
  0x2b   : > { %1736 = vmatprep.mubr.msk.bf16.mxu1 %vm1961_vm1, %v1960_v1 }
  0x31   : > { %1705 = vmatmul.mubr.msk.bf16.gmra.mrb[8].mxu0 %vm295_vm2, %v1853_v7 }
  0x32   : > { %1737 = vmatmul.mubr.msk.bf16.gmra.mrb[8].mxu1 %vm295_vm2, %v1854_v8  ;;  %1708 = vmatprep.mubr.msk.bf16.mxu0 %vm1961_vm1, %v1960_v1 }
  0x33   : > { %1740 = vmatprep.mubr.msk.bf16.mxu1 %vm1961_vm1, %v1960_v1 }
  0x39   : > { %1709 = vmatmul.mubr.msk.bf16.gmra.mrb[12].mxu0 %vm295_vm2, %v1855_v9 }
  0x3a   : > { %1712 = vmatprep.mubr.msk.bf16.mxu0 %vm1961_vm1, %v1960_v1  ;;  %1741 = vmatmul.mubr.msk.bf16.gmra.mrb[12].mxu1 %vm295_vm2, %v1858_v10 }
  0x3b   : > { %1744 = vmatprep.mubr.msk.bf16.mxu1 %vm1961_vm1, %v1960_v1 }
  0x41   : > { %1713 = vmatmul.mubr.msk.bf16.gmra.mrb[16].mxu0 %vm295_vm2, %v1856_v11 }
  0x42   : > { %1716 = vmatprep.mubr.msk.bf16.mxu0 %vm1961_vm1, %v1960_v1  ;;  %1745 = vmatmul.mubr.msk.bf16.gmra.mrb[16].mxu1 %vm295_vm2, %v1861_v12 }
  0x43   : > { %1748 = vmatprep.mubr.msk.bf16.mxu1 %vm1961_vm1, %v1960_v1 }
  0x49   : > { %1717 = vmatmul.mubr.msk.bf16.gmra.mrb[20].mxu0 %vm295_vm2, %v1857_v13 }
  0x4a   : > { %1720 = vmatprep.mubr.msk.bf16.mxu0 %vm1961_vm1, %v1960_v1  ;;  %1749 = vmatmul.mubr.msk.bf16.gmra.mrb[20].mxu1 %vm295_vm2, %v1862_v14 }
  0x4b   : > { %1752 = vmatprep.mubr.msk.bf16.mxu1 %vm1961_vm1, %v1960_v1 }
  0x51   : > { %1721 = vmatmul.mubr.msk.bf16.gmra.mrb[24].mxu0 %vm295_vm2, %v1859_v15 }
  0x52   : > { %1724 = vmatprep.mubr.msk.bf16.mxu0 %vm1961_vm1, %v1960_v1  ;;  %1753 = vmatmul.mubr.msk.bf16.gmra.mrb[24].mxu1 %vm295_vm2, %v1863_v16  ;;  %vm1537_vm1 = vcmask 850944  }
  0x59   : > { %1725 = vmatmul.mubr.msk.bf16.gmra.mrb[28].mxu0 %vm295_vm2, %v1860_v17  ;;  %vm1539_vm2 = vcmask 916480  }
  0xf4   : > { %v2127_v18 = vpop.f32.mrb[0].mxu0 }
  0xf5   : > { %v2129_v19 = vpop.f32.mrb[0].mxu1  ;;  %v1698_v20 = vpop.f32.mrb[1].mxu0  ;;  %v523_v25 = vrot.slane %v2127_v18, 1  ;;  %v628_v26 = vrot.slane %v2127_v18, 2 }
  0xf6   : > { %752 = vrot.lane.b32.xlu1 %v2129_v19, %s1962_s27  ;;  %v2133_v21 = vpop.f32.mrb[2].mxu0  ;;  %v1730_v22 = vpop.f32.mrb[1].mxu1  ;;  %v549_v23 = vrot.slane %v2129_v19, 1  ;;  %v2925_v24 = vrot.slane %v2129_v19, 2 }
  0xf7   : > { %v524_v27 = vrot.slane %v2133_v21, 1  ;;  %v629_v28 = vrot.slane %v2133_v21, 2  ;;  %v1699_v29 = vpop.f32.mrb[3].mxu0  ;;  %v446_v30 = vpop.f32.mrb[2].mxu1 }
  0xf8   : > { %v551_v31 = vrot.slane %v446_v30, 1  ;;  %v656_v32 = vrot.slane %v446_v30, 2  ;;  %v1731_v33 = vpop.f32.mrb[3].mxu1 }
  0xf9   : > { %v525_v34 = vsel %vm522_vm3, %v523_v25, %v524_v27  ;;  %v630_v35 = vsel %vm627_vm4, %v628_v26, %v629_v28 }
  0xfa   : > { %953 = vrot.lane.b32.xlu1 %v2129_v19, %s1963_s28  ;;  %563 = vrot.lane.b32.xlu0 %v525_v34, %s2927_s29  ;;  %v552_v36 = vsel %vm522_vm3, %v549_v23, %v551_v31  ;;  %v2152_v37 = vsel %vm627_vm4, %v2925_v24, %v656_v32 }
  0xfc   : > { %v387_v38 = vpop.f32.mrb[4].mxu0 }
  0xfd   : > { %v526_v39 = vrot.slane %v387_v38, 1  ;;  %v631_v40 = vrot.slane %v387_v38, 2  ;;  %v2154_v41 = vpop.f32.mrb[4].mxu1  ;;  %v1702_v42 = vpop.f32.mrb[5].mxu0 }
  0xfe   : > { %585 = vrot.lane.b32.xlu1 %v552_v36, %s2927_s29  ;;  %668 = vrot.lane.b32.xlu0 %v630_v35, %s1965_s4  ;;  %v1734_v43 = vpop.f32.mrb[5].mxu1  ;;  %v2158_v44 = vpop.f32.mrb[6].mxu0  ;;  %v553_v45 = vrot.slane %v2154_v41, 1  ;;  %v658_v46 = vrot.slane %v2154_v41, 2 }
  0xff   : > { %v2162_v47 = vpop.f32.mrb[6].mxu1  ;;  %v1703_v48 = vpop.f32.mrb[7].mxu0  ;;  %v2165_v49 = vsel %vm522_vm3, %v524_v27, %v526_v39  ;;  %v2168_v50 = vsel %vm627_vm4, %v629_v28, %v631_v40  ;;  %v528_v56 = vrot.slane %v2158_v44, 1  ;;  %v633_v57 = vrot.slane %v2158_v44, 2 }
 0x100   : > { %v1735_v51 = vpop.f32.mrb[7].mxu1  ;;  %v554_v52 = vrot.slane %v2162_v47, 1  ;;  %v659_v53 = vrot.slane %v2162_v47, 2 }
 0x102   : > { %690 = vrot.lane.b32.xlu1 %v2152_v37, %s1965_s4  ;;  %891 = vrot.lane.b32.xlu0 %v2152_v37, %s1966_s5  ;;  %v2177_v54 = vsel %vm522_vm3, %v553_v45, %v554_v52  ;;  %v2180_v55 = vsel %vm627_vm4, %v658_v46, %v659_v53 }
 0x104   : > { %v2184_v58 = vpop.f32.mrb[8].mxu0 }
 0x105   : > { %v459_v59 = vpop.f32.mrb[8].mxu1  ;;  %v529_v60 = vrot.slane %v2184_v58, 1  ;;  %v634_v61 = vrot.slane %v2184_v58, 2  ;;  %v1706_v62 = vpop.f32.mrb[9].mxu0 }
 0x106   : > { %822 = vrot.lane.b32.xlu1 %v552_v36, %s1967_s6  ;;  %v556_v63 = vrot.slane %v459_v59, 1  ;;  %v661_v0 = vrot.slane %v459_v59, 2  ;;  %754 = vrot.lane.b32.xlu0 %v2154_v41, %s1962_s27  ;;  %v398_v1 = vpop.f32.mrb[10].mxu0  ;;  %v1738_v2 = vpop.f32.mrb[9].mxu1 }
 0x107   : > { %v531_v3 = vrot.slane %v398_v1, 1  ;;  %v636_v4 = vrot.slane %v398_v1, 2  ;;  %v1707_v5 = vpop.f32.mrb[11].mxu0  ;;  %v2191_v6 = vpop.f32.mrb[10].mxu1  ;;  %v2194_v7 = vsel %vm522_vm3, %v528_v56, %v529_v60  ;;  %v2197_v8 = vsel %vm627_vm4, %v633_v57, %v634_v61 }
 0x108   : > { %v1739_v9 = vpop.f32.mrb[11].mxu1  ;;  %v2200_v10 = vsel %vm522_vm3, %v554_v52, %v556_v63  ;;  %v2203_v11 = vsel %vm627_vm4, %v659_v53, %v661_v0  ;;  %v558_v15 = vrot.slane %v2191_v6, 1  ;;  %v663_v16 = vrot.slane %v2191_v6, 2 }
 0x109   : > { %v2206_v12 = vsel %vm522_vm3, %v529_v60, %v531_v3  ;;  %v2209_v13 = vsel %vm627_vm4, %v634_v61, %v636_v4 }
 0x10a   : > { %1023 = vrot.lane.b32.xlu1 %v552_v36, %s1968_s7  ;;  %734 = vrot.lane.b32.xlu0 %v2158_v44, %s1962_s27 }
 0x10c   : > { %v2214_v14 = vpop.f32.mrb[12].mxu0 }
 0x10d   : > { %v1710_v17 = vpop.f32.mrb[13].mxu0  ;;  %v2218_v20 = vpop.f32.mrb[12].mxu1  ;;  %v533_v22 = vrot.slane %v2214_v14, 1  ;;  %v638_v25 = vrot.slane %v2214_v14, 2 }
 0x10e   : > { %955 = vrot.lane.b32.xlu1 %v2154_v41, %s1963_s28  ;;  %957 = vrot.lane.b32.xlu0 %v2162_v47, %s1963_s28  ;;  %v2226_v26 = vpop.f32.mrb[14].mxu0  ;;  %v1742_v27 = vpop.f32.mrb[13].mxu1  ;;  %v559_v28 = vrot.slane %v2218_v20, 1  ;;  %v664_v29 = vrot.slane %v2218_v20, 2 }
 0x10f   : > { %v1711_v30 = vpop.f32.mrb[15].mxu0  ;;  %v470_v31 = vpop.f32.mrb[14].mxu1  ;;  %v534_v32 = vrot.slane %v2226_v26, 1  ;;  %v639_v33 = vrot.slane %v2226_v26, 2 }
 0x110   : > { %v561_v34 = vrot.slane %v470_v31, 1  ;;  %v666_v35 = vrot.slane %v470_v31, 2  ;;  %v1743_v36 = vpop.f32.mrb[15].mxu1  ;;  %v2233_v38 = vsel %vm522_vm3, %v558_v15, %v559_v28  ;;  %v2236_v39 = vsel %vm627_vm4, %v663_v16, %v664_v29 }
 0x111   : > { %v2239_v40 = vsel %vm522_vm3, %v533_v22, %v534_v32  ;;  %v2242_v42 = vsel %vm627_vm4, %v638_v25, %v639_v33 }
 0x112   : > { %756 = vrot.lane.b32.xlu1 %v2162_v47, %s1962_s27  ;;  %565 = vrot.lane.b32.xlu0 %v2165_v49, %s2927_s29  ;;  %v2249_v43 = vsel %vm522_vm3, %v559_v28, %v561_v34  ;;  %v2252_v45 = vsel %vm627_vm4, %v664_v29, %v666_v35 }
 0x114   : > { %v411_v46 = vpop.f32.mrb[16].mxu0 }
 0x115   : > { %v536_v48 = vrot.slane %v411_v46, 1  ;;  %v641_v51 = vrot.slane %v411_v46, 2  ;;  %v1714_v52 = vpop.f32.mrb[17].mxu0  ;;  %v2254_v53 = vpop.f32.mrb[16].mxu1 }
 0x116   : > { %670 = vrot.lane.b32.xlu1 %v2168_v50, %s1965_s4  ;;  %587 = vrot.lane.b32.xlu0 %v2177_v54, %s2927_s29  ;;  %v2260_v56 = vpop.f32.mrb[18].mxu0  ;;  %v799_v49 = vrot.slane %v2254_v53, 1  ;;  %v868_v57 = vrot.slane %v2254_v53, 2  ;;  %v1746_v59 = vpop.f32.mrb[17].mxu1 }
 0x117   : > { %v1715_v60 = vpop.f32.mrb[19].mxu0  ;;  %v2264_v61 = vpop.f32.mrb[18].mxu1  ;;  %v2267_v62 = vsel %vm522_vm3, %v534_v32, %v536_v48  ;;  %v2270_v63 = vsel %vm627_vm4, %v639_v33, %v641_v51  ;;  %v538_v4 = vrot.slane %v2260_v56, 1  ;;  %v643_v5 = vrot.slane %v2260_v56, 2 }
 0x118   : > { %v800_v50 = vrot.slane %v2264_v61, 1  ;;  %v869_v0 = vrot.slane %v2264_v61, 2  ;;  %v1747_v1 = vpop.f32.mrb[19].mxu1 }
 0x11a   : > { %1025 = vrot.lane.b32.xlu1 %v2177_v54, %s1968_s7  ;;  %692 = vrot.lane.b32.xlu0 %v2180_v55, %s1965_s4  ;;  %v2279_v2 = vsel %vm522_vm3, %v799_v49, %v800_v50  ;;  %v2282_v3 = vsel %vm627_vm4, %v868_v57, %v869_v0 }
 0x11c   : > { %v2286_v9 = vpop.f32.mrb[20].mxu0 }
 0x11d   : > { %v1718_v15 = vpop.f32.mrb[21].mxu0  ;;  %v483_v16 = vpop.f32.mrb[20].mxu1  ;;  %v539_v17 = vrot.slane %v2286_v9, 1  ;;  %v644_v22 = vrot.slane %v2286_v9, 2 }
 0x11e   : > { %1094 = vrot.lane.b32.xlu1 %v2180_v55, %s1969_s8  ;;  %824 = vrot.lane.b32.xlu0 %v2177_v54, %s1967_s6  ;;  %v422_v25 = vpop.f32.mrb[22].mxu0  ;;  %v802_v27 = vrot.slane %v483_v16, 1  ;;  %v871_v28 = vrot.slane %v483_v16, 2  ;;  %v1750_v29 = vpop.f32.mrb[21].mxu1 }
 0x11f   : > { %v541_v30 = vrot.slane %v422_v25, 1  ;;  %v646_v31 = vrot.slane %v422_v25, 2  ;;  %v1719_v32 = vpop.f32.mrb[23].mxu0  ;;  %v2294_v33 = vpop.f32.mrb[22].mxu1  ;;  %v2297_v34 = vsel %vm522_vm3, %v538_v4, %v539_v17  ;;  %v2300_v35 = vsel %vm627_vm4, %v643_v5, %v644_v22 }
 0x120   : > { %v1751_v36 = vpop.f32.mrb[23].mxu1  ;;  %v2303_v46 = vsel %vm522_vm3, %v800_v50, %v802_v27  ;;  %v2306_v54 = vsel %vm627_vm4, %v869_v0, %v871_v28  ;;  %v1004_v49 = vrot.slane %v2294_v33, 1  ;;  %v1073_v57 = vrot.slane %v2294_v33, 2 }
 0x121   : > { %v2309_v48 = vsel %vm522_vm3, %v539_v17, %v541_v30  ;;  %v2312_v51 = vsel %vm627_vm4, %v644_v22, %v646_v31 }
 0x122   : > { %736 = vrot.lane.b32.xlu1 %v2184_v58, %s1962_s27  ;;  %893 = vrot.lane.b32.xlu0 %v2180_v55, %s1966_s5 }
 0x124   : > { %v2318_v52 = vpop.f32.mrb[24].mxu0 }
 0x125   : > { %2930 = vst [vmem:[#allocation5_spill] sm:$0xff] %v2318_v52  ;;  %v1722_v59 = vpop.f32.mrb[25].mxu0  ;;  %v2322_v60 = vpop.f32.mrb[24].mxu1  ;;  %v543_v28 = vrot.slane %v2318_v52, 1  ;;  %v648_v30 = vrot.slane %v2318_v52, 2 }
 0x126   : > { %567 = vrot.lane.b32.xlu1 %v2194_v7, %s2927_s29  ;;  %758 = vrot.lane.b32.xlu0 %v2191_v6, %s1962_s27  ;;  %v2328_v50 = vpop.f32.mrb[26].mxu0  ;;  %v1005_v0 = vrot.slane %v2322_v60, 1  ;;  %v1074_v55 = vrot.slane %v2322_v60, 2  ;;  %v1754_v1 = vpop.f32.mrb[25].mxu1 }
 0x127   : > { %v1723_v4 = vpop.f32.mrb[27].mxu0  ;;  %v544_v29 = vrot.slane %v2328_v50, 1  ;;  %v649_v31 = vrot.slane %v2328_v50, 2 }
 0x128   : > { %v2333_v5 = vsel %vm522_vm3, %v1004_v49, %v1005_v0  ;;  %v2336_v15 = vsel %vm627_vm4, %v1073_v57, %v1074_v55  ;;  %v494_v57 = vpop.f32.mrb[26].mxu1 }
 0x129   : > { %v2355_v59 = vsel %vm522_vm3, %v543_v28, %v544_v29  ;;  %v2358_v1 = vsel %vm627_vm4, %v648_v30, %v649_v31  ;;  %v1755_v24 = vpop.f32.mrb[27].mxu1 }
 0x12a   : > { %589 = vrot.lane.b32.xlu1 %v2200_v10, %s2927_s29  ;;  %959 = vrot.lane.b32.xlu0 %v2191_v6, %s1963_s28 }
 0x12c   : > { %v435_v16 = vpop.f32.mrb[28].mxu0 }
 0x12d   : > { %v546_v17 = vrot.slane %v435_v16, 1  ;;  %v651_v22 = vrot.slane %v435_v16, 2  ;;  %v1726_v25 = vpop.f32.mrb[29].mxu0 }
 0x12e   : > { %694 = vrot.lane.b32.xlu1 %v2203_v11, %s1965_s4  ;;  %672 = vrot.lane.b32.xlu0 %v2197_v8, %s1965_s4  ;;  %v2346_v27 = vpop.f32.mrb[30].mxu0  ;;  %v1007_v25 = vrot.slane %v494_v57, 1 }
 0x12f   : > { %v1727_v32 = vpop.f32.mrb[31].mxu0  ;;  %v548_v36 = vrot.slane %v2346_v27, 1  ;;  %v653_v49 = vrot.slane %v2346_v27, 2  ;;  %v2361_v4 = vsel %vm522_vm3, %v544_v29, %v546_v17  ;;  %v2364_v16 = vsel %vm627_vm4, %v649_v31, %v651_v22 }
 0x130   : > { %v1076_v32 = vrot.slane %v494_v57, 2  ;;  %v2931_v17 = vrot.slane %v2129_v19, 2 }
 0x131   : > { %v2373_v28 = vsel %vm522_vm3, %v548_v36, %v549_v23 }
 0x132   : > { %826 = vrot.lane.b32.xlu1 %v2200_v10, %s1967_s6  ;;  %804 = vrot.lane.b32.xlu0 %v2194_v7, %s1967_s6  ;;  %v2378_v29 = vsel %vm627_vm4, %v653_v49, %v2931_v17  ;;  %v2385_v7 = vsel %vm522_vm3, %v1005_v0, %v1007_v25  ;;  %v2388_v24 = vsel %vm627_vm4, %v1074_v55, %v1076_v32  ;;  %vm1541_vm3 = vcmask 982016  }
 0x136   : > { %895 = vrot.lane.b32.xlu1 %v2203_v11, %s1966_s5  ;;  %873 = vrot.lane.b32.xlu0 %v2197_v8, %s1966_s5 }
 0x13a   : > { %569 = vrot.lane.b32.xlu1 %v2206_v12, %s2927_s29  ;;  %1027 = vrot.lane.b32.xlu0 %v2200_v10, %s1968_s7 }
 0x13e   : > { %674 = vrot.lane.b32.xlu1 %v2209_v13, %s1965_s4  ;;  %738 = vrot.lane.b32.xlu0 %v2214_v14, %s1962_s27 }
 0x142   : > { %806 = vrot.lane.b32.xlu1 %v2206_v12, %s1967_s6  ;;  %941 = vrot.lane.b32.xlu0 %v2226_v26, %s1963_s28 }
 0x146   : > { %875 = vrot.lane.b32.xlu1 %v2209_v13, %s1966_s5  ;;  %591 = vrot.lane.b32.xlu0 %v2233_v38, %s2927_s29 }
 0x14a   : > { %760 = vrot.lane.b32.xlu1 %v2218_v20, %s1962_s27  ;;  %696 = vrot.lane.b32.xlu0 %v2236_v39, %s1965_s4 }
 0x14e   : > { %939 = vrot.lane.b32.xlu1 %v2214_v14, %s1963_s28  ;;  %828 = vrot.lane.b32.xlu0 %v2233_v38, %s1967_s6 }
 0x152   : > { %961 = vrot.lane.b32.xlu1 %v2218_v20, %s1963_s28  ;;  %1029 = vrot.lane.b32.xlu0 %v2233_v38, %s1968_s7 }
 0x156   : > { %740 = vrot.lane.b32.xlu1 %v2226_v26, %s1962_s27  ;;  %1098 = vrot.lane.b32.xlu0 %v2236_v39, %s1969_s8 }
 0x15a   : > { %897 = vrot.lane.b32.xlu1 %v2236_v39, %s1966_s5  ;;  %571 = vrot.lane.b32.xlu0 %v2239_v40, %s2927_s29 }
 0x15e   : > { %593 = vrot.lane.b32.xlu1 %v2249_v43, %s2927_s29  ;;  %676 = vrot.lane.b32.xlu0 %v2242_v42, %s1965_s4 }
 0x162   : > { %698 = vrot.lane.b32.xlu1 %v2252_v45, %s1965_s4  ;;  %808 = vrot.lane.b32.xlu0 %v2239_v40, %s1967_s6 }
 0x166   : > { %830 = vrot.lane.b32.xlu1 %v2249_v43, %s1967_s6  ;;  %877 = vrot.lane.b32.xlu0 %v2242_v42, %s1966_s5 }
 0x168   : > { %v2438_v23 = vpop.permute.xlu1 %752 }
 0x169   : > { %2932 = vst [vmem:[#allocation6_spill] sm:$0xff] %v2438_v23 }
 0x16a   : > { %1009 = vrot.lane.b32.xlu1 %v2239_v40, %s1968_s7  ;;  %899 = vrot.lane.b32.xlu0 %v2252_v45, %s1966_s5 }
 0x16c   : > { %v2444_v8 = vpop.permute.xlu1 %953  ;;  %v2446_v10 = vpop.permute.xlu0 %563 }
 0x16d   : > { %2933 = vst [vmem:[#allocation7_spill] sm:$0xff] %v2444_v8 }
 0x16e   : > { %1078 = vrot.lane.b32.xlu1 %v2242_v42, %s1969_s8  ;;  %762 = vrot.lane.b32.xlu0 %v2254_v53, %s1962_s27 }
 0x170   : > { %v2452_v12 = vpop.permute.xlu1 %585  ;;  %v2454_v13 = vpop.permute.xlu0 %668 }
 0x172   : > { %1031 = vrot.lane.b32.xlu1 %v2249_v43, %s1968_s7  ;;  %742 = vrot.lane.b32.xlu0 %v2260_v56, %s1962_s27 }
 0x174   : > { %v2460_v38 = vpop.permute.xlu1 %690  ;;  %v2462_v39 = vpop.permute.xlu0 %891 }
 0x175   : > { %2934 = vst [vmem:[#allocation8_spill] sm:$0xff] %v2462_v39 }
 0x176   : > { %963 = vrot.lane.b32.xlu1 %v2254_v53, %s1963_s28  ;;  %943 = vrot.lane.b32.xlu0 %v2260_v56, %s1963_s28 }
 0x178   : > { %v2468_v40 = vpop.permute.xlu1 %822  ;;  %v2470_v42 = vpop.permute.xlu0 %754 }
 0x179   : > { %2935 = vst [vmem:[#allocation9_spill] sm:$0xff] %v2468_v40  ;;  %2936 = vst [vmem:[#allocation10_spill] sm:$0xff] %v2470_v42 }
 0x17a   : > { %764 = vrot.lane.b32.xlu1 %v2264_v61, %s1962_s27  ;;  %965 = vrot.lane.b32.xlu0 %v2264_v61, %s1963_s28 }
 0x17c   : > { %v2476_v43 = vpop.permute.xlu1 %1023  ;;  %v2478_v0 = vpop.permute.xlu0 %734 }
 0x17d   : > { %2937 = vst [vmem:[#allocation11_spill] sm:$0xff] %v2476_v43 }
 0x17e   : > { %573 = vrot.lane.b32.xlu1 %v2267_v62, %s2927_s29  ;;  %1011 = vrot.lane.b32.xlu0 %v2267_v62, %s1968_s7 }
 0x180   : > { %v2484_v53 = vpop.permute.xlu1 %955  ;;  %v2486_v55 = vpop.permute.xlu0 %957 }
 0x181   : > { %2938 = vst [vmem:[#allocation12_spill] sm:$0xff] %v2484_v53  ;;  %2939 = vst [vmem:[#allocation13_spill] sm:$0xff] %v2486_v55 }
 0x182   : > { %678 = vrot.lane.b32.xlu1 %v2270_v63, %s1965_s4  ;;  %1080 = vrot.lane.b32.xlu0 %v2270_v63, %s1969_s8 }
 0x184   : > { %v2492_v61 = vpop.permute.xlu1 %756  ;;  %v2494_v22 = vpop.permute.xlu0 %565 }
 0x186   : > { %810 = vrot.lane.b32.xlu1 %v2267_v62, %s1967_s6  ;;  %832 = vrot.lane.b32.xlu0 %v2279_v2, %s1967_s6 }
 0x188   : > { %v2500_v30 = vpop.permute.xlu1 %670  ;;  %v2502_v31 = vpop.permute.xlu0 %587 }
 0x18a   : > { %879 = vrot.lane.b32.xlu1 %v2270_v63, %s1966_s5  ;;  %901 = vrot.lane.b32.xlu0 %v2282_v3, %s1966_s5 }
 0x18c   : > { %v2508_v36 = vpop.permute.xlu1 %1025  ;;  %v2510_v49 = vpop.permute.xlu0 %692 }
 0x18d   : > { %2940 = vst [vmem:[#allocation14_spill] sm:$0xff] %v2508_v36 }
 0x18e   : > { %1033 = vrot.lane.b32.xlu1 %v2279_v2, %s1968_s7  ;;  %967 = vrot.lane.b32.xlu0 %v2294_v33, %s1963_s28 }
 0x190   : > { %v2516_v62 = vpop.permute.xlu1 %1094  ;;  %v2518_v57 = vpop.permute.xlu0 %824 }
 0x191   : > { %2941 = vst [vmem:[#allocation15_spill] sm:$0xff] %v2516_v62  ;;  %2942 = vst [vmem:[#allocation16_spill] sm:$0xff] %v2518_v57 }
 0x192   : > { %1102 = vrot.lane.b32.xlu1 %v2282_v3, %s1969_s8  ;;  %575 = vrot.lane.b32.xlu0 %v2297_v34, %s2927_s29 }
 0x194   : > { %v2524_v63 = vpop.permute.xlu1 %736  ;;  %v2526_v25 = vpop.permute.xlu0 %893 }
 0x195   : > { %2943 = vst [vmem:[#allocation17_spill] sm:$0xff] %v2526_v25 }
 0x196   : > { %744 = vrot.lane.b32.xlu1 %v2286_v9, %s1962_s27  ;;  %680 = vrot.lane.b32.xlu0 %v2300_v35, %s1965_s4 }
 0x198   : > { %v2532_v2 = vpop.permute.xlu1 %567  ;;  %v2534_v33 = vpop.permute.xlu0 %758 }
 0x19a   : > { %945 = vrot.lane.b32.xlu1 %v2286_v9, %s1963_s28  ;;  %812 = vrot.lane.b32.xlu0 %v2297_v34, %s1967_s6 }
 0x19c   : > { %v2540_v3 = vpop.permute.xlu1 %589  ;;  %v2542_v32 = vpop.permute.xlu0 %959 }
 0x19d   : > { %2944 = vst [vmem:[#allocation18_spill] sm:$0xff] %v2542_v32 }
 0x19e   : > { %834 = vrot.lane.b32.xlu1 %v2303_v46, %s1967_s6  ;;  %1013 = vrot.lane.b32.xlu0 %v2297_v34, %s1968_s7 }
 0x1a0   : > { %v2548_v17 = vpop.permute.xlu1 %694  ;;  %v2550_v62 = vpop.permute.xlu0 %672 }
 0x1a2   : > { %881 = vrot.lane.b32.xlu1 %v2300_v35, %s1966_s5  ;;  %1082 = vrot.lane.b32.xlu0 %v2300_v35, %s1969_s8 }
 0x1a4   : > { %v827_v55 = vpop.permute.xlu1 %826  ;;  %v805_v43 = vpop.permute.xlu0 %804 }
 0x1a6   : > { %903 = vrot.lane.b32.xlu1 %v2306_v54, %s1966_s5  ;;  %1035 = vrot.lane.b32.xlu0 %v2303_v46, %s1968_s7 }
 0x1a8   : > { %v896_v36 = vpop.permute.xlu1 %895  ;;  %v874_v34 = vpop.permute.xlu0 %873 }
 0x1aa   : > { %577 = vrot.lane.b32.xlu1 %v2309_v48, %s2927_s29  ;;  %883 = vrot.lane.b32.xlu0 %v2312_v51, %s1966_s5 }
 0x1ac   : > { %v570_v53 = vpop.permute.xlu1 %569  ;;  %v2564_v32 = vpop.permute.xlu0 %1027 }
 0x1ad   : > { %2945 = vst [vmem:[#allocation19_spill] sm:$0xff] %v2564_v32  ;;  %v611_v32 = vadd.f32 %v2446_v10, %v2127_v18 }
 0x1ae   : > { %682 = vrot.lane.b32.xlu1 %v2312_v51, %s1965_s4  ;;  %746 = vrot.lane.b32.xlu0 %v2318_v52, %s1962_s27 }
 0x1af   : > { %v716_v40 = vadd.f32 %v2454_v13, %v611_v32 }
 0x1b0   : > { %v675_v35 = vpop.permute.xlu1 %674  ;;  %v739_v39 = vpop.permute.xlu0 %738 }
 0x1b2   : > { %814 = vrot.lane.b32.xlu1 %v2309_v48, %s1967_s6  ;;  %949 = vrot.lane.b32.xlu0 %v2328_v50, %s1963_s28 }
 0x1b4   : > { %v2574_v46 = vpop.permute.xlu1 %806  ;;  %v2576_v8 = vpop.permute.xlu0 %941 }
 0x1b6   : > { %1015 = vrot.lane.b32.xlu1 %v2309_v48, %s1968_s7  ;;  %1037 = vrot.lane.b32.xlu0 %v2333_v5, %s1968_s7  ;;  %v622_v48 = vadd.f32 %v2452_v12, %v2129_v19  ;;  %v782_v5 = vadd.f32 %v2478_v0, %v716_v40  ;;  %v614_v0 = vadd.f32 %v570_v53, %v2184_v58 }
 0x1b8   : > { %v2584_v25 = vpop.permute.xlu1 %875  ;;  %v2586_v57 = vpop.permute.xlu0 %591  ;;  %v727_v18 = vadd.f32 %v2460_v38, %v622_v48  ;;  %v852_v10 = vadd.f32 %v805_v43, %v782_v5 }
 0x1ba   : > { %947 = vrot.lane.b32.xlu1 %v2318_v52, %s1963_s28  ;;  %1106 = vrot.lane.b32.xlu0 %v2336_v15, %s1969_s8  ;;  %v793_v13 = vadd.f32 %v2492_v61, %v727_v18  ;;  %v921_v15 = vadd.f32 %v874_v34, %v852_v10  ;;  %v719_v34 = vadd.f32 %v675_v35, %v614_v0 }
 0x1bc   : > { %v761_v42 = vpop.permute.xlu1 %760  ;;  %v2596_v23 = vpop.permute.xlu0 %696  ;;  %v863_v19 = vadd.f32 %v827_v55, %v793_v13 }
 0x1be   : > { %969 = vrot.lane.b32.xlu1 %v2322_v60, %s1963_s28  ;;  %579 = vrot.lane.b32.xlu0 %v2355_v59, %s2927_s29  ;;  %v932_v38 = vadd.f32 %v896_v36, %v863_v19  ;;  %v623_v60 = vadd.f32 %v2502_v31, %v2154_v41 }
 0x1c0   : > { %v940_v32 = vpop.permute.xlu1 %939  ;;  %v829_v52 = vpop.permute.xlu0 %828  ;;  %v728_v55 = vadd.f32 %v2510_v49, %v623_v60  ;;  %v613_v49 = vadd.f32 %v2532_v2, %v2158_v44 }
 0x1c1   : > { %v987_v12 = vadd.f32 %v940_v32, %v921_v15 }
 0x1c2   : > { %748 = vrot.lane.b32.xlu1 %v2328_v50, %s1962_s27  ;;  %684 = vrot.lane.b32.xlu0 %v2358_v1, %s1965_s4  ;;  %v794_v5 = vadd.f32 %v2534_v33, %v728_v55  ;;  %v718_v10 = vadd.f32 %v2550_v62, %v613_v49  ;;  %v612_v55 = vadd.f32 %v2494_v22, %v2133_v21 }
 0x1c4   : > { %v962_v40 = vpop.permute.xlu1 %961  ;;  %v2608_v43 = vpop.permute.xlu0 %1029  ;;  %v864_v41 = vadd.f32 %v829_v52, %v794_v5 }
 0x1c5   : > { %v998_v61 = vadd.f32 %v962_v40, %v932_v38 }
 0x1c6   : > { %1017 = vrot.lane.b32.xlu1 %v2355_v59, %s1968_s7  ;;  %816 = vrot.lane.b32.xlu0 %v2355_v59, %s1967_s6 }
 0x1c8   : > { %v741_v48 = vpop.permute.xlu1 %740  ;;  %v2618_v36 = vpop.permute.xlu0 %1098 }
 0x1c9   : > { %v2621_v18 = vadd.f32 %v741_v48, %v719_v34 }
 0x1ca   : > { %1086 = vrot.lane.b32.xlu1 %v2358_v1, %s1969_s8  ;;  %885 = vrot.lane.b32.xlu0 %v2358_v1, %s1966_s5 }
 0x1cc   : > { %v898_v58 = vpop.permute.xlu1 %897  ;;  %v572_v53 = vpop.permute.xlu0 %571 }
 0x1cd   : > { %v933_v59 = vadd.f32 %v898_v58, %v864_v41  ;;  %v615_v31 = vadd.f32 %v572_v53, %v2214_v14  ;;  %v624_v14 = vadd.f32 %v2540_v3, %v2162_v47  ;;  %v625_v3 = vadd.f32 %v2586_v57, %v2191_v6 }
 0x1ce   : > { %1039 = vrot.lane.b32.xlu1 %v2385_v7, %s1968_s7  ;;  %750 = vrot.lane.b32.xlu0 %v2346_v27, %s1962_s27  ;;  %v784_v7 = vadd.f32 %v739_v39, %v718_v10 }
 0x1cf   : > { %v729_v44 = vadd.f32 %v2548_v17, %v624_v14 }
 0x1d0   : > { %v594_v33 = vpop.permute.xlu1 %593  ;;  %v677_v35 = vpop.permute.xlu0 %676 }
 0x1d1   : > { %v626_v52 = vadd.f32 %v594_v33, %v2218_v20  ;;  %v720_v1 = vadd.f32 %v677_v35, %v615_v31  ;;  %v795_v20 = vadd.f32 %v761_v42, %v729_v44  ;;  %v730_v42 = vadd.f32 %v2596_v23, %v625_v3 }
 0x1d2   : > { %581 = vrot.lane.b32.xlu1 %v2361_v4, %s2927_s29  ;;  %951 = vrot.lane.b32.xlu0 %v2346_v27, %s1963_s28 }
 0x1d4   : > { %v699_v13 = vpop.permute.xlu1 %698  ;;  %v809_v15 = vpop.permute.xlu0 %808 }
 0x1d5   : > { %v731_v2 = vadd.f32 %v699_v13, %v626_v52  ;;  %v854_v32 = vadd.f32 %v809_v15, %v784_v7 }
 0x1d6   : > { %686 = vrot.lane.b32.xlu1 %v2364_v16, %s1965_s4  ;;  %1019 = vrot.lane.b32.xlu0 %v2361_v4, %s1968_s7 }
 0x1d8   : > { %v831_v62 = vpop.permute.xlu1 %830  ;;  %v878_v19 = vpop.permute.xlu0 %877 }
 0x1d9   : > { %v865_v38 = vadd.f32 %v831_v62, %v795_v20  ;;  %v923_v40 = vadd.f32 %v878_v19, %v854_v32 }
 0x1da   : > { %818 = vrot.lane.b32.xlu1 %v2361_v4, %s1967_s6  ;;  %583 = vrot.lane.b32.xlu0 %v2373_v28, %s2927_s29  ;;  %s1978_s29 = smov 56  }
 0x1dc   : > { %v1010_v47 = vpop.permute.xlu1 %1009  ;;  %v900_v39 = vpop.permute.xlu0 %899 }
 0x1dd   : > { %v1057_v17 = vadd.f32 %v1010_v47, %v987_v12  ;;  %v934_v60 = vadd.f32 %v900_v39, %v865_v38  ;;  %v717_v12 = vadd.f32 %v2500_v30, %v612_v55 }
 0x1de   : > { %887 = vrot.lane.b32.xlu1 %v2364_v16, %s1966_s5  ;;  %688 = vrot.lane.b32.xlu0 %v2378_v29, %s1965_s4 }
 0x1df   : > { %v783_v21 = vadd.f32 %v2524_v63, %v717_v12 }
 0x1e0   : > { %v1079_v0 = vpop.permute.xlu1 %1078  ;;  %v763_v4 = vpop.permute.xlu0 %762 }
 0x1e1   : > { %v2660_v34 = vadd.f32 %v1079_v0, %v1057_v17  ;;  %v796_v48 = vadd.f32 %v763_v4, %v730_v42  ;;  %v853_v58 = vadd.f32 %v2574_v46, %v783_v21 }
 0x1e2   : > { %889 = vrot.lane.b32.xlu1 %v2378_v29, %s1966_s5  ;;  %820 = vrot.lane.b32.xlu0 %v2373_v28, %s1967_s6 }
 0x1e3   : > { %v922_v30 = vadd.f32 %v2584_v25, %v853_v58 }
 0x1e4   : > { %v1032_v6 = vpop.permute.xlu1 %1031  ;;  %v743_v57 = vpop.permute.xlu0 %742 }
 0x1e5   : > { %v2667_v5 = vadd.f32 %v1032_v6, %v998_v61  ;;  %v786_v23 = vadd.f32 %v743_v57, %v720_v1  ;;  %v988_v63 = vadd.f32 %v2576_v8, %v922_v30 }
 0x1e6   : > { %1084 = vrot.lane.b32.xlu1 %v2312_v51, %s1969_s8  ;;  %1088 = vrot.lane.b32.xlu0 %v2364_v16, %s1969_s8 }
 0x1e8   : > { %v964_v22 = vpop.permute.xlu1 %963  ;;  %v944_v41 = vpop.permute.xlu0 %943 }
 0x1e9   : > { %v999_v53 = vadd.f32 %v964_v22, %v933_v59  ;;  %v989_v31 = vadd.f32 %v944_v41, %v923_v40 }
 0x1ea   : > { %1092 = vrot.lane.b32.xlu1 %v2152_v37, %s1969_s8  ;;  %1021 = vrot.lane.b32.xlu0 %v2373_v28, %s1968_s7 }
 0x1ec   : > { %v765_v51 = vpop.permute.xlu1 %764  ;;  %v966_v61 = vpop.permute.xlu0 %965 }
 0x1ed   : > { %v797_v49 = vadd.f32 %v765_v51, %v731_v2  ;;  %v1000_v16 = vadd.f32 %v966_v61, %v934_v60 }
 0x1ee   : > { %1100 = vrot.lane.b32.xlu1 %v2252_v45, %s1969_s8  ;;  %1090 = vrot.lane.b32.xlu0 %v2378_v29, %s1969_s8 }
 0x1f0   : > { %v574_v46 = vpop.permute.xlu1 %573  ;;  %v1012_v59 = vpop.permute.xlu0 %1011 }
 0x1f1   : > { %v616_v37 = vadd.f32 %v574_v46, %v2226_v26  ;;  %v1058_v33 = vadd.f32 %v1012_v59, %v988_v63 }
 0x1f2   : > { %1108 = vrot.lane.b32.xlu1 %v2388_v24, %s1969_s8  ;;  %1096 = vrot.lane.b32.xlu0 %v2203_v11, %s1969_s8 }
 0x1f4   : > { %v679_v28 = vpop.permute.xlu1 %678  ;;  %v1081_v25 = vpop.permute.xlu0 %1080 }
 0x1f5   : > { %v721_v35 = vadd.f32 %v679_v28, %v616_v37  ;;  %v2690_v45 = vadd.f32 %v1081_v25, %v1058_v33 }
 0x1f6   : > { %1104 = vrot.lane.b32.xlu0 %v2306_v54, %s1969_s8 }
 0x1f8   : > { %v811_v29 = vpop.permute.xlu1 %810  ;;  %v833_v8 = vpop.permute.xlu0 %832 }
 0x1f9   : > { %v855_v10 = vadd.f32 %v811_v29, %v2621_v18  ;;  %v866_v26 = vadd.f32 %v833_v8, %v796_v48 }
 0x1fc   : > { %v880_v52 = vpop.permute.xlu1 %879  ;;  %v902_v1 = vpop.permute.xlu0 %901 }
 0x1fd   : > { %v924_v14 = vadd.f32 %v880_v52, %v855_v10  ;;  %v935_v24 = vadd.f32 %v902_v1, %v866_v26  ;;  %v2721_v26 = vld [vmem:[%s2923_s2] ss:$0 sm:$0xff] }
 0x200   : > { %v1034_v7 = vpop.permute.xlu1 %1033  ;;  %v968_v13 = vpop.permute.xlu0 %967 }
 0x201   : > { %v1069_v11 = vadd.f32 %v1034_v7, %v999_v53  ;;  %v1001_v15 = vadd.f32 %v968_v13, %v935_v24  ;;  %v1149_v24 = vadd.f32 %v2721_v26, %v2660_v34 }
 0x204   : > { %v1103_v44 = vpop.permute.xlu1 %1102  ;;  %v576_v2 = vpop.permute.xlu0 %575 }
 0x205   : > { %v2695_v32 = vadd.f32 %v1103_v44, %v1069_v11  ;;  %v617_v20 = vadd.f32 %v576_v2, %v2260_v56  ;;  %v1165_v44 = vmax.f32 %v1149_v24, 0.0 }
 0x208   : > { %v745_v54 = vpop.permute.xlu1 %744  ;;  %v681_v62 = vpop.permute.xlu0 %680 }
 0x209   : > { %v787_v19 = vadd.f32 %v745_v54, %v721_v35  ;;  %v722_v38 = vadd.f32 %v681_v62, %v617_v20 }
 0x20c   : > { %v946_v18 = vpop.permute.xlu1 %945  ;;  %v813_v40 = vpop.permute.xlu0 %812 }
 0x20d   : > { %v2698_v47 = vadd.f32 %v946_v18, %v924_v14  ;;  %v856_v39 = vadd.f32 %v813_v40, %v786_v23 }
 0x210   : > { %v835_v3 = vpop.permute.xlu1 %834  ;;  %v1014_v17 = vpop.permute.xlu0 %1013 }
 0x211   : > { %v867_v60 = vadd.f32 %v835_v3, %v797_v49  ;;  %v1059_v42 = vadd.f32 %v1014_v17, %v989_v31 }
 0x214   : > { %v882_v0 = vpop.permute.xlu1 %881  ;;  %v1083_v4 = vpop.permute.xlu0 %1082 }
 0x215   : > { %v925_v55 = vadd.f32 %v882_v0, %v856_v39  ;;  %v2700_v48 = vadd.f32 %v1083_v4, %v1059_v42  ;;  %v2946_v42 = vld [vmem:[#allocation5_spill] sm:$0xff] }
 0x218   : > { %v904_v6 = vpop.permute.xlu1 %903  ;;  %v1036_v56 = vpop.permute.xlu0 %1035 }
 0x219   : > { %v2702_v57 = vadd.f32 %v904_v6, %v867_v60  ;;  %v2704_v12 = vadd.f32 %v1036_v56, %v1000_v16  ;;  %v1970_v6 = vmov 1983009808  }
 0x21a   : > { %v1184_v56 = vunpack.c.l.s4 %v1970_v6 }
 0x21c   : > { %v578_v21 = vpop.permute.xlu1 %577  ;;  %v884_v22 = vpop.permute.xlu0 %883 }
 0x21d   : > { %v618_v34 = vadd.f32 %v578_v21, %v2286_v9  ;;  %v1971_v9 = vmov 1934713408  }
 0x21e   : > { %v1248_v21 = vunpack.c.l.s4 %v1971_v9 }
 0x220   : > { %v683_v41 = vpop.permute.xlu1 %682  ;;  %v747_v58 = vpop.permute.xlu0 %746 }
 0x221   : > { %v2706_v23 = vadd.f32 %v747_v58, %v722_v38  ;;  %v723_v60 = vadd.f32 %v683_v41, %v618_v34  ;;  %v2947_v58 = vld [vmem:[#allocation6_spill] sm:$0xff] }
 0x224   : > { %v815_v53 = vpop.permute.xlu1 %814  ;;  %v950_v30 = vpop.permute.xlu0 %949 }
 0x225   : > { %v857_v31 = vadd.f32 %v815_v53, %v787_v19 }
 0x227   : > { %v926_v51 = vadd.f32 %v884_v22, %v857_v31  ;;  %v1186_v22 = vlaneseq }
 0x228   : > { %v2708_v61 = vpop.permute.xlu1 %1015  ;;  %v1038_v49 = vpop.permute.xlu0 %1037 }
 0x229   : > { %v2710_v63 = vadd.f32 %v950_v30, %v926_v51  ;;  %v1071_v46 = vadd.f32 %v1038_v49, %v1001_v15 }
 0x22c   : > { %v948_v59 = vpop.permute.xlu1 %947  ;;  %v1107_v37 = vpop.permute.xlu0 %1106 }
 0x22d   : > { %v2712_v16 = vadd.f32 %v1107_v37, %v1071_v46  ;;  %v991_v10 = vadd.f32 %v948_v59, %v925_v55  ;;  %v2948_v59 = vld [vmem:[#allocation10_spill] sm:$0xff]  ;;  %v1185_v37 = vunpack.c.0.s8 %v1184_v56 }
 0x230   : > { %v2714_v33 = vpop.permute.xlu1 %969  ;;  %v580_v28 = vpop.permute.xlu0 %579 }
 0x231   : > { %v619_v0 = vadd.f32 %v580_v28, %v2946_v42  ;;  %v1187_v28 = vshrl.u32 %v1186_v22, 7  ;;  %v2953_v42 = vld [vmem:[#allocation8_spill] sm:$0xff] }
 0x233   : > { %v2752_v34 = vsub.s32 %v1185_v37, %v1187_v28 }
 0x234   : > { %v749_v25 = vpop.permute.xlu1 %748  ;;  %v685_v35 = vpop.permute.xlu0 %684 }
 0x235   : > { %v789_v55 = vadd.f32 %v749_v25, %v723_v60  ;;  %v724_v51 = vadd.f32 %v685_v35, %v619_v0  ;;  %v1150_v35 = vadd.f32 %v2721_v26, %v2690_v45  ;;  %v2954_v0 = vld [vmem:[#allocation18_spill] sm:$0xff] }
 0x238   : > { %v1018_v29 = vpop.permute.xlu1 %1017  ;;  %v2716_v8 = vpop.permute.xlu0 %816 }
 0x239   : > { %v1061_v52 = vadd.f32 %v1018_v29, %v991_v10  ;;  %v2949_v29 = vld [vmem:[#allocation9_spill] sm:$0xff] }
 0x23c   : > { %v1087_v1 = vpop.permute.xlu1 %1086  ;;  %v2723_v14 = vpop.permute.xlu0 %885 }
 0x23d   : > { %v1130_v7 = vadd.f32 %v1087_v1, %v1061_v52  ;;  %v2950_v1 = vld [vmem:[#allocation16_spill] sm:$0xff] }
 0x23f   : > { %v1153_v13 = vadd.f32 %v2721_v26, %v1130_v7 }
 0x240   : > { %v2728_v11 = vpop.permute.xlu1 %1039  ;;  %v751_v15 = vpop.permute.xlu0 %750 }
 0x241   : > { %v1169_v2 = vmax.f32 %v1153_v13, 0.0  ;;  %v790_v46 = vadd.f32 %v751_v15, %v724_v51  ;;  %v1161_v13 = vadd.f32 %v2721_v26, %v2695_v32  ;;  %v1060_v15 = vadd.f32 %v2708_v61, %v2698_v47  ;;  %v2955_v32 = vld [vmem:[#allocation12_spill] sm:$0xff] }
 0x242   : > { %v1166_v47 = vmax.f32 %v1150_v35, 0.0  ;;  %v2760_v61 = vadd.f32 %v2721_v26, %v2700_v48  ;;  %v1163_v51 = vadd.f32 %v2721_v26, %v2712_v16  ;;  %v1002_v16 = vadd.f32 %v2714_v33, %v2702_v57  ;;  %v2960_v33 = vld [vmem:[#allocation19_spill] sm:$0xff] }
 0x243   : > { %v2730_v20 = vcombine.low %v1165_v44, %v1169_v2  ;;  %v2732_v54 = vcombine.high %v1165_v44, %v1169_v2  ;;  %v1249_v44 = vunpack.c.0.s8 %v1248_v21  ;;  %v1177_v22 = vmax.f32 %v1161_v13, 0.0 }
 0x244   : > { %v582_v62 = vpop.permute.xlu1 %581  ;;  %v2734_v19 = vpop.permute.xlu0 %951 }
 0x245   : > { %v620_v40 = vadd.f32 %v582_v62, %v2328_v50  ;;  %v2951_v62 = vld [vmem:[#allocation17_spill] sm:$0xff] }
 0x248   : > { %v687_v38 = vpop.permute.xlu1 %686  ;;  %v1020_v18 = vpop.permute.xlu0 %1019 }
 0x249   : > { %v725_v39 = vadd.f32 %v687_v38, %v620_v40  ;;  %v1062_v2 = vadd.f32 %v1020_v18, %v2710_v63  ;;  %v858_v63 = vadd.f32 %v2716_v8, %v2706_v23  ;;  %v2764_v18 = vsub.s32 %v1249_v44, %v1187_v28 }
 0x24a   : > { %v1167_v28 = vmax.f32 %v2760_v61, 0.0 }
 0x24b   : > { %v791_v53 = vadd.f32 %v2947_v58, %v725_v39  ;;  %v2952_v39 = vld [vmem:[#allocation7_spill] sm:$0xff] }
 0x24c   : > { %v819_v3 = vpop.permute.xlu1 %818  ;;  %v584_v17 = vpop.permute.xlu0 %583 }
 0x24d   : > { %v621_v4 = vadd.f32 %v584_v17, %v2346_v27  ;;  %v859_v49 = vadd.f32 %v819_v3, %v789_v55  ;;  %v861_v27 = vadd.f32 %v2949_v29, %v791_v53  ;;  %v2956_v53 = vld [vmem:[#allocation14_spill] sm:$0xff] }
 0x24f   : > { %v930_v45 = vadd.f32 %v2953_v42, %v861_v27 }
 0x250   : > { %v888_v30 = vpop.permute.xlu1 %887  ;;  %v689_v31 = vpop.permute.xlu0 %688 }
 0x251   : > { %v726_v50 = vadd.f32 %v689_v31, %v621_v4  ;;  %v928_v25 = vadd.f32 %v888_v30, %v859_v49  ;;  %v2957_v49 = vld [vmem:[#allocation11_spill] sm:$0xff] }
 0x253   : > { %v792_v41 = vadd.f32 %v2948_v59, %v726_v50  ;;  %v994_v3 = vadd.f32 %v2952_v39, %v928_v25  ;;  %v927_v50 = vadd.f32 %v2723_v14, %v858_v63  ;;  %v2959_v59 = vld [vmem:[#allocation15_spill] sm:$0xff] }
 0x254   : > { %v890_v10 = vpop.permute.xlu1 %889  ;;  %v821_v52 = vpop.permute.xlu0 %820 }
 0x255   : > { %v862_v24 = vadd.f32 %v2950_v1, %v792_v41  ;;  %v860_v7 = vadd.f32 %v821_v52, %v790_v46  ;;  %v1064_v48 = vadd.f32 %v2957_v49, %v994_v3  ;;  %v2958_v46 = vld [vmem:[#allocation13_spill] sm:$0xff]  ;;  %v993_v14 = vadd.f32 %v2734_v19, %v927_v50 }
 0x256   : > { %v996_v23 = vadd.f32 %v2958_v46, %v930_v45  ;;  %v1072_v1 = vadd.f32 %v2728_v11, %v1002_v16 }
 0x257   : > { %v931_v38 = vadd.f32 %v2951_v62, %v862_v24  ;;  %v929_v40 = vadd.f32 %v890_v10, %v860_v7 }
 0x258   : > { %v1085_v17 = vpop.permute.xlu1 %1084  ;;  %v1089_v60 = vpop.permute.xlu0 %1088  ;;  %v1066_v19 = vadd.f32 %v2960_v33, %v996_v23 }
 0x259   : > { %v997_v4 = vadd.f32 %v2954_v0, %v931_v38  ;;  %v995_v55 = vadd.f32 %v2955_v32, %v929_v40  ;;  %v1129_v6 = vadd.f32 %v1085_v17, %v1060_v15  ;;  %v1131_v56 = vadd.f32 %v1089_v60, %v1062_v2 }
 0x25b   : > { %v1067_v58 = vadd.f32 %v2608_v43, %v997_v4  ;;  %v1065_v30 = vadd.f32 %v2956_v53, %v995_v55  ;;  %v1154_v31 = vadd.f32 %v2721_v26, %v1131_v56  ;;  %v1152_v43 = vadd.f32 %v2721_v26, %v1129_v6 }
 0x25c   : > { %v1093_v9 = vpop.permute.xlu1 %1092  ;;  %v1022_v21 = vpop.permute.xlu0 %1021 }
 0x25d   : > { %v1136_v8 = vadd.f32 %v2618_v36, %v1067_v58  ;;  %v1134_v41 = vadd.f32 %v2959_v59, %v1065_v30  ;;  %v1170_v37 = vmax.f32 %v1154_v31, 0.0  ;;  %v1133_v29 = vadd.f32 %v1093_v9, %v1064_v48 }
 0x25e   : > { %v1179_v36 = vmax.f32 %v1163_v51, 0.0  ;;  %v1063_v7 = vadd.f32 %v1022_v21, %v993_v14  ;;  %v1168_v57 = vmax.f32 %v1152_v43, 0.0  ;;  %v1189_v59 = vrot.slane %v2730_v20, %v2752_v34 }
 0x25f   : > { %v1159_v27 = vadd.f32 %v2721_v26, %v1136_v8  ;;  %v1157_v25 = vadd.f32 %v2721_v26, %v1134_v41  ;;  %v1317_v10 = vcombine.low %v1166_v47, %v1170_v37  ;;  %v1318_v52 = vcombine.high %v1166_v47, %v1170_v37 }
 0x260   : > { %v1156_v24 = vadd.f32 %v2721_v26, %v1133_v29  ;;  %v1101_v35 = vpop.permute.xlu1 %1100  ;;  %v1091_v13 = vpop.permute.xlu0 %1090  ;;  %v1196_v41 = vrot.slane %v2732_v54, %v2752_v34 }
 0x261   : > { %v1175_v44 = vmax.f32 %v1159_v27, 0.0  ;;  %v1173_v15 = vmax.f32 %v1157_v25, 0.0  ;;  %v2787_v2 = vrot.slane %v1317_v10, %v2752_v34  ;;  %v1137_v38 = vadd.f32 %v1101_v35, %v2667_v5 }
 0x262   : > { %v1172_v62 = vmax.f32 %v1156_v24, 0.0  ;;  %v1132_v40 = vadd.f32 %v1091_v13, %v1063_v7  ;;  %v2795_v5 = vrot.slane %v1318_v52, %v2752_v34 }
 0x263   : > { %v1213_v39 = vcombine.low %v1173_v15, %v1177_v22  ;;  %v1214_v3 = vcombine.high %v1173_v15, %v1177_v22  ;;  %v1229_v11 = vcombine.low %v1175_v44, %v1179_v36  ;;  %v1230_v17 = vcombine.high %v1175_v44, %v1179_v36 }
 0x264   : > { %v1333_v60 = vcombine.low %v1168_v57, %v1172_v62  ;;  %v1334_v42 = vcombine.high %v1168_v57, %v1172_v62  ;;  %v1160_v45 = vadd.f32 %v2721_v26, %v1137_v38  ;;  %v1155_v0 = vadd.f32 %v2721_v26, %v1132_v40  ;;  %v1109_v4 = vpop.permute.xlu1 %1108  ;;  %v1097_v32 = vpop.permute.xlu0 %1096 }
 0x265   : > { %v1141_v55 = vadd.f32 %v1109_v4, %v1072_v1  ;;  %v1135_v6 = vadd.f32 %v1097_v32, %v1066_v19  ;;  %v1221_v56 = vrot.slane %v1213_v39, %v2752_v34  ;;  %v1237_v47 = vrot.slane %v1229_v11, %v2752_v34 }
 0x266   : > { %v1341_v61 = vrot.slane %v1333_v60, %v2752_v34  ;;  %v2799_v63 = vrot.slane %v1334_v42, %v2752_v34  ;;  %v1171_v22 = vmax.f32 %v1155_v0, 0.0  ;;  %v1176_v21 = vmax.f32 %v1160_v45, 0.0 }
 0x267   : > { %v1164_v58 = vadd.f32 %v2721_v26, %v1141_v55  ;;  %v1158_v53 = vadd.f32 %v2721_v26, %v1135_v6  ;;  %v1277_v30 = vcombine.low %v1221_v56, %v1237_v47  ;;  %v1278_v31 = vcombine.high %v1221_v56, %v1237_v47 }
 0x268   : > { %v1381_v51 = vcombine.low %v2787_v2, %v1341_v61  ;;  %v1382_v50 = vcombine.high %v2787_v2, %v1341_v61  ;;  %v1397_v49 = vcombine.low %v2795_v5, %v2799_v63  ;;  %v1398_v48 = vcombine.high %v2795_v5, %v2799_v63  ;;  %v1105_v9 = vpop.permute.xlu0 %1104 }
 0x269   : > { %v1197_v46 = vcombine.low %v1167_v28, %v1171_v22  ;;  %v1198_v23 = vcombine.high %v1167_v28, %v1171_v22  ;;  %v1180_v8 = vmax.f32 %v1164_v58, 0.0  ;;  %v1174_v43 = vmax.f32 %v1158_v53, 0.0 }
 0x26a   : > { %v1139_v37 = vadd.f32 %v1105_v9, %v2704_v12  ;;  %v2818_v28 = vrot.slane %v1277_v30, %v2764_v18  ;;  %v1228_v10 = vrot.slane %v1214_v3, %v2752_v34  ;;  %v1244_v20 = vrot.slane %v1230_v17, %v2752_v34 }
 0x26b   : > { %v1205_v16 = vrot.slane %v1197_v46, %v2752_v34  ;;  %v1212_v14 = vrot.slane %v1198_v23, %v2752_v34  ;;  %v1365_v29 = vcombine.low %v1176_v21, %v1180_v8  ;;  %v1366_v27 = vcombine.high %v1176_v21, %v1180_v8 }
 0x26c   : > { %v1162_v25 = vadd.f32 %v2721_v26, %v1139_v37  ;;  %v1292_v7 = vrot.slane %v1278_v31, %v2764_v18  ;;  %v1293_v35 = vcombine.low %v1228_v10, %v1244_v20  ;;  %v1294_v2 = vcombine.high %v1228_v10, %v1244_v20 }
 0x26d   : > { %v1245_v52 = vcombine.low %v1189_v59, %v1205_v16  ;;  %v1246_v54 = vcombine.high %v1189_v59, %v1205_v16  ;;  %v1261_v36 = vcombine.low %v1196_v41, %v1212_v14  ;;  %v1262_v1 = vcombine.high %v1196_v41, %v1212_v14 }
 0x26e   : > { %v1373_v12 = vrot.slane %v1365_v29, %v2752_v34  ;;  %v1178_v24 = vmax.f32 %v1162_v25, 0.0  ;;  %v1380_v13 = vrot.slane %v1366_v27, %v2752_v34  ;;  %v1301_v19 = vrot.slane %v1293_v35, %v2764_v18 }
 0x26f   : > { %v2826_v26 = vrot.slane %v1245_v52, %v2764_v18  ;;  %v1260_v44 = vrot.slane %v1246_v54, %v2764_v18  ;;  %v1269_v15 = vrot.slane %v1261_v36, %v2764_v18  ;;  %v1276_v39 = vrot.slane %v1262_v1, %v2764_v18 }
 0x270   : > { %v1349_v57 = vcombine.low %v1174_v43, %v1178_v24  ;;  %v1350_v33 = vcombine.high %v1174_v43, %v1178_v24  ;;  %v1308_v42 = vrot.slane %v1294_v2, %v2764_v18  ;;  %v1389_v6 = vrot.slane %v1381_v51, %v2764_v18 }
 0x271   : > { %v1310_v62 = vcombine.high %v2826_v26, %v2818_v28  ;;  %v1311_v38 = vcombine.low %v1260_v44, %v1292_v7  ;;  %v1312_v40 = vcombine.high %v1260_v44, %v1292_v7  ;;  %v1313_v17 = vcombine.low %v1269_v15, %v1301_v19 }
 0x272   : > { %v1357_v3 = vrot.slane %v1349_v57, %v2752_v34  ;;  %v1364_v11 = vrot.slane %v1350_v33, %v2752_v34  ;;  %v1314_v60 = vcombine.high %v1269_v15, %v1301_v19  ;;  %v1309_v45 = vcombine.low %v2826_v26, %v2818_v28 }
 0x273   : > { %v1396_v56 = vrot.slane %v1382_v50, %v2764_v18  ;;  %v1315_v47 = vcombine.low %v1276_v39, %v1308_v42  ;;  %v1316_v5 = vcombine.high %v1276_v39, %v1308_v42  ;;  %v1405_v58 = vrot.slane %v1397_v49, %v2764_v18 }
 0x274   : > { %v1413_v0 = vcombine.low %v1357_v3, %v1373_v12  ;;  %v1414_v4 = vcombine.high %v1357_v3, %v1373_v12  ;;  %v1429_v32 = vcombine.low %v1364_v11, %v1380_v13  ;;  %v1430_v55 = vcombine.high %v1364_v11, %v1380_v13 }
 0x275   : > { %v1412_v53 = vrot.slane %v1398_v48, %v2764_v18 }
 0x276   : > { %v1421_v61 = vrot.slane %v1413_v0, %v2764_v18  ;;  %v1428_v34 = vrot.slane %v1414_v4, %v2764_v18  ;;  %v1437_v63 = vrot.slane %v1429_v32, %v2764_v18  ;;  %v1444_v22 = vrot.slane %v1430_v55, %v2764_v18 }
 0x278   : > { %v1446_v30 = vcombine.high %v1389_v6, %v1421_v61  ;;  %v1445_v31 = vcombine.low %v1389_v6, %v1421_v61  ;;  %v1448_v9 = vcombine.high %v1396_v56, %v1428_v34  ;;  %v1447_v51 = vcombine.low %v1396_v56, %v1428_v34 }
 0x279   : > { %v1449_v21 = vcombine.low %v1405_v58, %v1437_v63  ;;  %v1450_v50 = vcombine.high %v1405_v58, %v1437_v63  ;;  %v1451_v46 = vcombine.low %v1412_v53, %v1444_v22  ;;  %v1452_v23 = vcombine.high %v1412_v53, %v1444_v22 }
 0x27a   : > { %1486 = vrot.lane.b32.xlu0 %v1446_v30, %s1968_s7  ;;  %1482 = vrot.lane.b32.xlu1 %v1445_v31, %s1969_s8 }
 0x27e   : > { %1494 = vrot.lane.b32.xlu0 %v1448_v9, %s1966_s5  ;;  %1490 = vrot.lane.b32.xlu1 %v1447_v51, %s1963_s28  ;;  %s2961_s28 = smov 120  }
 0x282   : > { %1454 = vrot.lane.b32.xlu0 %v1310_v62, %s1972_s11  ;;  %1458 = vrot.lane.b32.xlu1 %v1311_v38, %s1973_s20 }
 0x286   : > { %1462 = vrot.lane.b32.xlu0 %v1312_v40, %s1974_s21  ;;  %1466 = vrot.lane.b32.xlu1 %v1313_v17, %s1975_s24  ;;  %s1979_s24 = smov [#allocation2]  }
 0x28a   : > { %1470 = vrot.lane.b32.xlu0 %v1314_v60, %s1976_s9  ;;  %1474 = vrot.lane.b32.xlu1 %v1315_v47, %s1977_s10  ;;  %s1868_s9 = sshll.u32 %s1979_s24, 4  ;;  %s1869_s9 = int_to_ptr.vmem [resolvable:$false] %s1868_s9 }
 0x28b   : > { %s1870_s10 = scalar_lea.vmem %s1869_s9, 256 }
 0x28e   : > { %1478 = vrot.lane.b32.xlu0 %v1316_v5, %s1978_s29  ;;  %1498 = vrot.lane.b32.xlu1 %v1449_v21, %s1967_s6 }
 0x292   : > { %1502 = vrot.lane.b32.xlu0 %v1450_v50, %s1962_s27  ;;  %1506 = vrot.lane.b32.xlu1 %v1451_v46, %s1965_s4  ;;  %s175_s27 = sand.u32 1, %s1934_s13   ;;  %s1674_s4 = sshll.u32 %s1946_s16, 1 }
 0x293   : > { %s2858_s29 = sshll.u32 %s175_s27, 3  ;;  %s1556_s5 = sadd.s32 %s1942_s15, %s1674_s4 }
 0x294   : > { %s1675_s6 = sshll.u32 %s1556_s5, 7  ;;  %s177_s16 = scalar_lea.vmem [#allocation2], %s2858_s29 }
 0x295   : > { %s1560_s7 = sshll.u32 %s177_s16, 4  ;;  %s2866_s11 = scalar_lea.hbm %s2924_s3, %s1675_s6  ;;  %s2868_s7 = int_to_ptr.vmem [resolvable:$true] %s1560_s7 }
 0x296   : > { %1510 = vrot.lane.b32.xlu0 %v1452_v23, %s2961_s28  ;;  %s1545_s20 = scalar_lea.sflag [#allocation3], %s175_s27  ;;  %s1864_s21 = scalar_lea.vmem %s2868_s7, 128 }
 0x297   : > { %p1865_p13 = scmp.ne.s32.totalorder %s2868_s7, %s1864_s21  ;;  %p1871_p2 = scmp.lt.s32.totalorder %s2868_s7, %s1869_s9 }
 0x298   : > { %p1872_p4 = scmp.lt.s32.totalorder %s1870_s10, %s1864_s21 }
 0x299   : > { %p1866_p0 = pnand %p1865_p13, %p2051_p3 }
 0x29a   : > { %p1873_p5 = por %p1872_p4, %p1871_p2 }
 0x29b   : > { %p1867_p1 = pneg %p1866_p0 }
 0x29d   : > { %p1874_p6 = pnand %p1873_p5, %p1867_p1 }
 0x2ec   : > { %v1487_v18 = vpop.permute.xlu0 %1486  ;;  %v1483_v49 = vpop.permute.xlu1 %1482 }
 0x2f0   : > { %v1495_v48 = vpop.permute.xlu0 %1494  ;;  %v1491_v8 = vpop.permute.xlu1 %1490 }
 0x2f4   : > { %v1455_v59 = vpop.permute.xlu0 %1454  ;;  %v1459_v41 = vpop.permute.xlu1 %1458 }
 0x2f5   : > { %v1514_v43 = vsel %vm1513_vm5, %v1309_v45, %v1455_v59 }
 0x2f6   : > { %v1516_v37 = vsel %vm1515_vm6, %v1514_v43, %v1459_v41 }
 0x2f8   : > { %v1463_v16 = vpop.permute.xlu0 %1462  ;;  %v1467_v14 = vpop.permute.xlu1 %1466 }
 0x2f9   : > { %v1518_v29 = vsel %vm1517_vm7, %v1516_v37, %v1463_v16 }
 0x2fa   : > { %v1520_v27 = vsel %vm1519_vm8, %v1518_v29, %v1467_v14 }
 0x2fc   : > { %v1471_v25 = vpop.permute.xlu0 %1470  ;;  %v1475_v28 = vpop.permute.xlu1 %1474 }
 0x2fd   : > { %v1522_v10 = vsel %vm1521_vm9, %v1520_v27, %v1471_v25 }
 0x2fe   : > { %v1524_v20 = vsel %vm1523_vm10, %v1522_v10, %v1475_v28 }
 0x300   : > { %v1479_v52 = vpop.permute.xlu0 %1478  ;;  %v1499_v36 = vpop.permute.xlu1 %1498 }
 0x301   : > { %v1526_v54 = vsel %vm1525_vm11, %v1524_v20, %v1479_v52 }
 0x302   : > { %v1528_v1 = vsel %vm1527_vm12, %v1526_v54, %v1483_v49 }
 0x303   : > { %v1530_v12 = vsel %vm1529_vm13, %v1528_v1, %v1487_v18 }
 0x304   : > { %v1532_v24 = vsel %vm1531_vm14, %v1530_v12, %v1491_v8  ;;  %v1503_v7 = vpop.permute.xlu0 %1502  ;;  %v1507_v44 = vpop.permute.xlu1 %1506 }
 0x305   : > { %v1534_v35 = vsel %vm1533_vm15, %v1532_v24, %v1495_v48 }
 0x306   : > { %v1536_v13 = vsel %vm1535_vm0, %v1534_v35, %v1499_v36 }
 0x307   : > { %v1538_v26 = vsel %vm1537_vm1, %v1536_v13, %v1503_v7 }
 0x308   : > { %v1540_v15 = vsel %vm1539_vm2, %v1538_v26, %v1507_v44  ;;  %v1511_v57 = vpop.permute.xlu0 %1510 }
 0x309   : > { %v1542_v33 = vsel %vm1541_vm3, %v1540_v15, %v1511_v57 }
 0x30a   : > { %1543 = vst [vmem:[%s177_s16] sm:$0xff] %v1542_v33 }
 0x30b   : > { %1877 = shalt.err (!%p1874_p6)
}
 0x30c   : > { %s1878_s28 = scalar_lea.hbm %s2866_s11, 128  ;;  %s1882_s4 = scalar_lea.hbm %s2924_s3, 512 }
 0x30d   : > { %p1879_p7 = scmp.ne.s32.totalorder %s2866_s11, %s1878_s28  ;;  %p1883_p11 = scmp.lt.u32.totalorder %s2866_s11, %s2924_s3 }
 0x30e   : > { %p1884_p12 = scmp.lt.u32.totalorder %s1882_s4, %s1878_s28  ;;  %p1886_p0 = scmp.lt.u32.totalorder %s1878_s28, %s2866_s11 }
 0x30f   : > { %p1880_p9 = pnand %p1879_p7, %p2051_p3 }
 0x310   : > { %p1885_p13 = por %p1884_p12, %p1883_p11 }
 0x311   : > { %p1881_p10 = pneg %p1880_p9 }
 0x312   : > { %p1887_p1 = por %p1886_p0, %p1885_p13 }
 0x314   : > { %p1888_p2 = pnand %p1887_p1, %p1881_p10 }
 0x316   : > { %1891 = shalt.err (!%p1888_p2)
}
 0x317   : > { %1759 = dma.vmem_to_hbm [thread:$0]  (%p2051_p3), %s2868_s7, 128, %s2866_s11, %s1545_s20  }
 0x318 PF: > { %p1765_p4 = scmp.ge.s32.totalorder %s1958_s19, 2  ;;  %s1572_s16 = sand.u32 1, %s1930_s12  }
 0x319   : > { %s1573_s8 = scalar_lea.sflag [#allocation3], %s1572_s16 }
 0x31a   : > { %p1762_p5 = pnand %p1765_p4, %p2060_p8 }
 0x31c   : > { %1925 = dma.done.wait (!%p1762_p5), %s1573_s8, 128  }
 0x31d   : > { %1927 = vsyncadd (!%p1762_p5), %s1573_s8, 4294967168  ;;  %s16_s19 = sadd.s32 1, %s1958_s19   ;;  %s2962_s12 = smov %s1934_s13 }
 0x31e   : > { %p13_p6 = scmp.ge.s32.totalorder %s16_s19, 6   ;;  %s2963_s13 = smov %s1938_s14 }
 0x31f   : > { %s2964_s14 = smov %s2069_s30  ;;  %s2965_s15 = smov %s1950_s17 }
 0x320   : > { %s2966_s16 = smov %s1954_s18  ;;  %s2967_s17 = smov %s2970_s22 }
 0x321   : > { %s2968_s18 = smov %s2974_s23  ;;  %15 = sbr.rel (!%p13_p6) target bundleno = 5 (0x5), region = 68 }
 0x328   :  { %1578 = vsyncpa [#allocation3], 1 }
 0x329   :  { %1580 = vsyncpa [#allocation3 + $0x1], 1 }

</bundles_post_ra>
